<compile_context>
chip_gen: v5e
topology: v5e:2x2
jax: 0.10.0
libtpu: 0.0.40
codegen_flags: <defaults>
</compile_context>

<pallas_src>
import jax
import jax.numpy as jnp
from jax.experimental import pallas as pl
from jax.experimental.pallas import tpu as pltpu


def _copy_kernel(x_ref, o_ref):
    # Straight lane-dense 2D copy of the current block.
    o_ref[...] = x_ref[...]


def _sublane_pack(dtype):
    """Row-tiling multiple: 8 for >=32-bit dtypes, 16 for 16-bit, 32 for 8-bit."""
    itemsize = jnp.dtype(dtype).itemsize
    if itemsize >= 4:
        return 8
    return 32 // itemsize


def _vmem_budget():
    """Return (per-buffer tile cap bytes, vmem_limit_bytes) for this chip."""
    vmem = None
    try:
        info = pltpu.get_tpu_info()
        vmem = getattr(info, "vmem_capacity_bytes", None)
    except Exception:
        vmem = None
    if vmem is not None and vmem >= 100 * 1024 * 1024:
        # v5e / v6e class: 128 MiB physical VMEM -> bigger tiles, fewer steps.
        return 8 * 1024 * 1024, 64 * 1024 * 1024
    # v7x class (64 MiB per TC) or unknown: keep (in+out) x 2 buffers <= ~24 MiB.
    return 6 * 1024 * 1024, 32 * 1024 * 1024


def _tiled_copy_2d(x2, buf_cap_bytes, vmem_limit_bytes, lane_tile_cap=2048,
                   alias_input=False):
    """Double-buffered tiled identity copy of a 2D array via pallas_call."""
    rows, cols = x2.shape
    itemsize = jnp.dtype(x2.dtype).itemsize
    sub = _sublane_pack(x2.dtype)

    # Lane tile: full extent if the dim is small, otherwise a fixed multiple of
    # 128; Pallas masks the trailing partial block (no divisor requirement).
    tile_f = cols if cols <= lane_tile_cap else lane_tile_cap

    # Row tile: as many rows as fit under the per-buffer byte cap (multiple of
    # the sublane pack); full extent if the whole row dim already fits.
    row_cap = max(sub, (buf_cap_bytes // max(tile_f * itemsize, 1)) // sub * sub)
    tile_n = rows if rows <= row_cap else row_cap

    grid = (pl.cdiv(rows, tile_n), pl.cdiv(cols, tile_f))

    return pl.pallas_call(
        _copy_kernel,
        out_shape=jax.ShapeDtypeStruct((rows, cols), x2.dtype),
        grid=grid,
        in_specs=[pl.BlockSpec((tile_n, tile_f), lambda i, j: (i, j))],
        out_specs=pl.BlockSpec((tile_n, tile_f), lambda i, j: (i, j)),
        compiler_params=pltpu.CompilerParams(
            dimension_semantics=("parallel", "parallel"),
            vmem_limit_bytes=vmem_limit_bytes,
        ),
        # Only a real win when the caller donates x; otherwise XLA preserves
        # the input with an extra copy, so it stays opt-in.
        input_output_aliases={0: 0} if alias_input else {},
    )(x2)


def flatten_layer(x, *, use_pallas=True, alias_input=False):
    """Pallas equivalent of FlattenLayer.forward: (N, ...) -> (N, prod(...))."""
    n = x.shape[0]
    flat = 1
    for d in x.shape[1:]:
        flat *= d

    # Metadata-only flatten (matches torch .view on contiguous input). This is
    # the production-optimal path on its own.
    x2 = jnp.reshape(x, (n, flat))
    if not use_pallas:
        return x2

    buf_cap, vmem_limit = _vmem_budget()
    total = n * flat

    # Prefer a lane-dense slab view of the contiguous buffer: unmasked 128-lane
    # stores regardless of how n/flat factor, and tile choice is decoupled from
    # the logical shape. Both reshapes are metadata-only (row-major contiguous).
    slab_l = 0
    for L in (4096, 2048, 1024, 512, 256, 128):
        if total % L == 0:
            slab_l = L
            break

    if slab_l:
        slab = jnp.reshape(x2, (total // slab_l, slab_l))
        out = _tiled_copy_2d(slab, buf_cap, vmem_limit,
                             lane_tile_cap=slab_l, alias_input=alias_input)
        return jnp.reshape(out, (n, flat))

    # Awkward total (not a multiple of 128): copy the (n, flat) view directly
    # with fixed cdiv tiles; trailing partial blocks are masked (correct, just
    # slightly slower stores).
    return _tiled_copy_2d(x2, buf_cap, vmem_limit, alias_input=alias_input)


if __name__ == "__main__":
    key = jax.random.PRNGKey(0)
    # Small NCHW input consistent with typical conv feature maps.
    x = jax.random.normal(key, (2, 4, 16, 16), dtype=jnp.float32)

    y = flatten_layer(x)
    jax.block_until_ready(y)

    # Sanity check against plain JAX reshape (== torch .view on contiguous x).
    y_ref = jnp.reshape(x, (x.shape[0], -1))
    assert y.shape == (2, 4 * 16 * 16), y.shape
    assert jnp.array_equal(y, y_ref), "mismatch vs reference reshape"

    # Also exercise an awkward shape (N not a multiple of 8, flat not a
    # multiple of 128) to validate the cdiv / full-extent fallback path.
    x_odd = jax.random.normal(jax.random.PRNGKey(0), (3, 5, 7, 9),
                              dtype=jnp.float32)
    y_odd = flatten_layer(x_odd)
    jax.block_until_ready(y_odd)
    assert jnp.array_equal(y_odd, jnp.reshape(x_odd, (x_odd.shape[0], -1)))

    print("KERNEL_OK")
</pallas_src>

<mosaic_0001>
module attributes {stable_mosaic.version = 11 : i64} {
  func.func @_copy_kernel(%arg0: i32, %arg1: i32, %arg2: memref<1x2048xf32, #tpu.memory_space<vmem>>, %arg3: memref<1x2048xf32, #tpu.memory_space<vmem>>) attributes {dimension_semantics = [#tpu.dimension_semantics<parallel>, #tpu.dimension_semantics<parallel>], iteration_bounds = array<i64: 1, 1>, scalar_prefetch = 0 : i64, scratch_operands = 0 : i64, tpu.core_type = #tpu.core_type<tc>, window_params = [{transform_indices = @transform_0, window_bounds = array<i64: 1, 2048>}, {transform_indices = @transform_1, window_bounds = array<i64: 1, 2048>}]} {
    %c0 = arith.constant 0 : index
    %c0_0 = arith.constant 0 : index
    %0 = vector.load %arg2[%c0, %c0_0] : memref<1x2048xf32, #tpu.memory_space<vmem>>, vector<1x2048xf32>
    %c0_1 = arith.constant 0 : index
    %c0_2 = arith.constant 0 : index
    %1 = vector.load %arg3[%c0_1, %c0_2] : memref<1x2048xf32, #tpu.memory_space<vmem>>, vector<1x2048xf32>
    tpu.vector_store %arg3[%c0_1, %c0_2], %0 {strides = array<i32>} : memref<1x2048xf32, #tpu.memory_space<vmem>>, vector<1x2048xf32>,
    return
  }
  func.func @transform_0(%arg0: i32, %arg1: i32) -> (i32, i32) {
    %c0_i32 = arith.constant 0 : i32
    return %arg0, %arg1 : i32, i32
  }
  func.func @transform_1(%arg0: i32, %arg1: i32) -> (i32, i32) {
    %c0_i32 = arith.constant 0 : i32
    return %arg0, %arg1 : i32, i32
  }
}

</mosaic_0001>

<bundles_post_ra>
// kernel: tpu_custom_call.1
= control target key start
LH: loop header
LB: loop body
LE: loop exit
PB: predicated region body
PF: predicated region fallthrough
CT: control target
= control target key end

     0   :  { %6 = vsyncpa [#allocation3], 0  ;;  %s116_s0 = inlined_call_operand.hbm [shape: f32[1,2048], index: 0, kind: input, shape index: {}]   ;;  %s117_s1 = inlined_call_operand.hbm [shape: f32[1,2048], index: 1, kind: output, shape index: {}]  }
   0x1   :  { %7 = vsyncpa [#allocation4], 0  ;;  %s13_s8 = sshll.u32 %s116_s0, 4  ;;  %s98_s9 = smov [#allocation2]   ;;  %s14_s8 = int_to_ptr.hbm [resolvable:$true] %s13_s8 }
   0x2   :  { %s15_s10 = sshll.u32 %s98_s9, 4  ;;  %s16_s10 = int_to_ptr.vmem [resolvable:$true] %s15_s10 }
   0x3   :  { %18 = dma.hbm_to_vmem [thread:$0]  %s14_s8, 256, %s16_s10, [#allocation3]  }
   0x4   :  { %94 = dma.done.wait [#allocation3], 256  }
   0x5   :  { %95 = vsyncadd [#allocation3], 4294967040  ;;  %s99_s11 = smov [#allocation5]   ;;  %s34_s15 = sshll.u32 %s117_s1, 4  ;;  %v23_v0 = vld [vmem:[#allocation2] sm:$0xff]  ;;  %v24_v1 = vld [vmem:[#allocation2 + $0x8] sm:$0xff]  ;;  %s35_s15 = int_to_ptr.hbm [resolvable:$true] %s34_s15 }
   0x6   :  { %s32_s12 = sshll.u32 %s99_s11, 4  ;;  %25 = vst [vmem:[#allocation5] sm:$0xff] %v23_v0  ;;  %s33_s12 = int_to_ptr.vmem [resolvable:$true] %s32_s12 }
   0x7   :  { %26 = vst [vmem:[#allocation5 + $0x8] sm:$0xff] %v24_v1 }
   0x8   :  { %37 = dma.vmem_to_hbm [thread:$0]  %s33_s12, 256, %s35_s15, [#allocation4]  }
   0x9   :  { %96 = dma.done.wait [#allocation4], 256  }
   0xa   :  { %97 = vsyncadd [#allocation4], 4294967040 }
   0xb   :  { %42 = vsyncpa [#allocation3], 1 }
   0xc   :  { %43 = vsyncpa [#allocation4], 1 }

</bundles_post_ra>
